<compile_context>
chip_gen: v7x
topology: tpu7x:2x2x1
jax: 0.10.0
libtpu: 0.0.40
codegen_flags: <defaults>
</compile_context>

<pallas_src>
import jax
import jax.numpy as jnp
from jax.experimental import pallas as pl
from jax.experimental.pallas import tpu as pltpu


# ----------------------------------------------------------------------------
# Pallas kernel: elementwise cast-to-f32 copy (the only compute in forward()).
# ----------------------------------------------------------------------------
def _cast_kernel(x_ref, o_ref):
    o_ref[...] = x_ref[...].astype(jnp.float32)


_LANE_CANDIDATES = (8192, 4096, 2048, 1024, 512, 256, 128)


def _sublane_pack(dtype):
    # rows-per-vreg for the given element width: 8 (4B), 16 (2B), 32 (1B)
    itemsize = jnp.dtype(dtype).itemsize
    return max(8, 32 // itemsize)


def _pick_slab(total, dtype):
    """Pick (rows, lanes) with lanes % 128 == 0 and rows % sublane_pack == 0."""
    sub = _sublane_pack(dtype)
    for lanes in _LANE_CANDIDATES:
        if total % lanes:
            continue
        rows = total // lanes
        if rows % sub == 0:
            return rows, lanes
    return None


def bay_encoder_forward(x):
    """Equivalent of BayEncoder.forward: x.float().flatten(1).

    x: array of shape [B, ...] (any trailing dims), any castable dtype.
    returns: float32 array of shape [B, prod(trailing dims)].
    """
    B = x.shape[0]
    F = 1
    for d in x.shape[1:]:
        F *= d
    total = B * F

    in_bytes = jnp.dtype(x.dtype).itemsize
    bytes_per_elem = in_bytes + 4  # read input + write f32 output

    cost = pl.CostEstimate(flops=0, transcendentals=0,
                           bytes_accessed=total * bytes_per_elem)
    cparams = pltpu.CompilerParams(
        dimension_semantics=("parallel",),
        vmem_limit_bytes=32 << 20,
    )

    slab = _pick_slab(total, x.dtype)

    if slab is None:
        # Ragged total: fall back to a single full-array block (block equal to
        # the full array dims always satisfies the tiling rule).
        x2d = x.reshape(B, F)
        return pl.pallas_call(
            _cast_kernel,
            out_shape=jax.ShapeDtypeStruct((B, F), jnp.float32),
            grid=(1,),
            in_specs=[pl.BlockSpec((B, F), lambda i: (0, 0))],
            out_specs=pl.BlockSpec((B, F), lambda i: (0, 0)),
            compiler_params=cparams,
            cost_estimate=cost,
        )(x2d)

    rows, lanes = slab
    sub = _sublane_pack(x.dtype)

    # Tile the row axis; keep double-buffered (in + out) per-step footprint
    # <= ~8 MiB so the scoped-VMEM limit holds on v5e/v6e/v7x.
    budget_elems = (8 << 20) // (2 * bytes_per_elem)
    tr_cap = max(sub, (budget_elems // lanes) // sub * sub)
    tile_rows = min(rows, tr_cap)

    # Row-major reshape => identical element order to torch.flatten(1).
    slab_in = x.reshape(rows, lanes)

    out = pl.pallas_call(
        _cast_kernel,
        out_shape=jax.ShapeDtypeStruct((rows, lanes), jnp.float32),
        grid=(pl.cdiv(rows, tile_rows),),
        in_specs=[pl.BlockSpec((tile_rows, lanes), lambda i: (i, 0))],
        out_specs=pl.BlockSpec((tile_rows, lanes), lambda i: (i, 0)),
        compiler_params=cparams,
        cost_estimate=cost,
    )(slab_in)
    return out.reshape(B, F)


# ----------------------------------------------------------------------------
# Deterministic parameter init mirroring BayEncoder.__init__ (params are NOT
# used by forward(), kept only for shape fidelity with the nn.Module).
# ----------------------------------------------------------------------------
def init_bay_encoder_params(rows, internal_hidden, key):
    kw, kb = jax.random.split(key)
    bound = 1.0 / (rows ** 0.5)
    # nn.Linear(rows, internal_hidden): weight [internal_hidden, rows], bias [internal_hidden]
    weight = jax.random.uniform(kw, (internal_hidden, rows),
                                minval=-bound, maxval=bound, dtype=jnp.float32)
    bias = jax.random.uniform(kb, (internal_hidden,),
                              minval=-bound, maxval=bound, dtype=jnp.float32)
    return {"linear_weight": weight, "linear_bias": bias}


if __name__ == "__main__":
    key = jax.random.PRNGKey(0)
    k_x, k_p = jax.random.split(key)

    # Module hyperparams (Linear/Tanh are unused in forward, init'd anyway).
    rows, internal_hidden, n_ports = 16, 32, 4
    params = init_bay_encoder_params(rows, internal_hidden, k_p)

    # Small NCHW input consistent with a conv-style encoder input.
    B, C, H, W = 2, 4, 16, 16
    # bf16 input so the in-kernel .float() cast is exercised.
    x = jax.random.normal(k_x, (B, C, H, W), dtype=jnp.bfloat16)

    out = bay_encoder_forward(x)
    out = jax.block_until_ready(out)

    # Reference check: flatten(1) + cast in plain JAX.
    ref = x.reshape(B, C * H * W).astype(jnp.float32)
    assert out.shape == (B, C * H * W), out.shape
    assert out.dtype == jnp.float32, out.dtype
    assert jnp.allclose(out, ref), "mismatch vs reference"

    print("KERNEL_OK")
</pallas_src>

<mosaic_0001>
module attributes {stable_mosaic.version = 11 : i64} {
  func.func @_cast_kernel(%arg0: i32, %arg1: memref<16x128xbf16, #tpu.memory_space<vmem>>, %arg2: memref<16x128xf32, #tpu.memory_space<vmem>>) attributes {dimension_semantics = [#tpu.dimension_semantics<parallel>], iteration_bounds = array<i64: 1>, scalar_prefetch = 0 : i64, scratch_operands = 0 : i64, tpu.core_type = #tpu.core_type<tc>, window_params = [{transform_indices = @transform_0, window_bounds = array<i64: 16, 128>}, {transform_indices = @transform_1, window_bounds = array<i64: 16, 128>}]} {
    %c0 = arith.constant 0 : index
    %c0_0 = arith.constant 0 : index
    %0 = vector.load %arg1[%c0, %c0_0] : memref<16x128xbf16, #tpu.memory_space<vmem>>, vector<16x128xbf16>
    %1 = arith.extf %0 : vector<16x128xbf16> to vector<16x128xf32>
    %c0_1 = arith.constant 0 : index
    %c0_2 = arith.constant 0 : index
    %2 = vector.load %arg2[%c0_1, %c0_2] : memref<16x128xf32, #tpu.memory_space<vmem>>, vector<16x128xf32>
    tpu.vector_store %arg2[%c0_1, %c0_2], %1 {strides = array<i32>} : memref<16x128xf32, #tpu.memory_space<vmem>>, vector<16x128xf32>,
    return
  }
  func.func @transform_0(%arg0: i32) -> (i32, i32) {
    %c0_i32 = arith.constant 0 : i32
    %c0_i32_0 = arith.constant 0 : i32
    return %arg0, %c0_i32 : i32, i32
  }
  func.func @transform_1(%arg0: i32) -> (i32, i32) {
    %c0_i32 = arith.constant 0 : i32
    %c0_i32_0 = arith.constant 0 : i32
    return %arg0, %c0_i32 : i32, i32
  }
}

</mosaic_0001>

<bundles_post_ra>
// kernel: tpu_custom_call.1
= control target key start
LH: loop header
LB: loop body
LE: loop exit
PB: predicated region body
PF: predicated region fallthrough
CT: control target
= control target key end

     0   :  { %6 = vsyncpa [#allocation3], 0  ;;  %s144_s0 = inlined_call_operand.hbm [shape: bf16[16,128], index: 0, kind: input, shape index: {}]   ;;  %s145_s1 = inlined_call_operand.hbm [shape: f32[16,128], index: 1, kind: output, shape index: {}]  }
   0x1   :  { %7 = vsyncpa [#allocation4], 0  ;;  %s104_s6 = smov [#allocation2]   ;;  %s56_s10 = scalar_lea.hbm %s144_s0, 128 }
   0x2   :  { %s13_s7 = sshll.u32 %s104_s6, 4  ;;  %p57_p0 = scmp.ne.s32.totalorder %s144_s0, %s56_s10  ;;  %s14_s7 = int_to_ptr.vmem [resolvable:$true] %s13_s7 }
   0x3   :  { %p60_p1 = scmp.lt.u32.totalorder %s56_s10, %s144_s0 }
   0x5   :  { %p62_p2 = pnand %p60_p1, %p57_p0 }
   0x7   :  { %65 = shalt.err (!%p62_p2)
}
   0x8   :  { %s66_s15 = scalar_lea.vmem %s14_s7, 128  ;;  %p71_p4 = scmp.lt.s32.totalorder %s14_s7, %s14_s7 }
   0x9   :  { %p67_p3 = scmp.ne.s32.totalorder %s14_s7, %s66_s15  ;;  %p72_p5 = scmp.lt.s32.totalorder %s66_s15, %s66_s15 }
   0xb   :  { %p73_p6 = por %p72_p5, %p71_p4 }
   0xd   :  { %p74_p7 = pnand %p73_p6, %p67_p3 }
   0xf   :  { %77 = shalt.err (!%p74_p7)
}
  0x10   :  { %s105_s16 = smov 64   ;;  %s106_s17 = smov 4  }
  0x11   :  { %19 = dma.hbm_to_vmem [thread:$0]  %s144_s0, 128, %s14_s7, [#allocation3], %s105_s16, %s105_s16, %s106_s17  }
  0x12   :  { %100 = dma.done.wait [#allocation3], 128  }
  0x13   :  { %101 = vsyncadd [#allocation3], 4294967168  ;;  %s107_s20 = smov [#allocation5]   ;;  %v47_v0 = vld [vmem:[#allocation2] sm:$0xff]  }
  0x14   :  { %s34_s21 = sshll.u32 %s107_s20, 4  ;;  %v48_v1 = vunpack.c.l.bf16 %v47_v0  ;;  %v49_v2 = vunpack.c.h.bf16 %v47_v0  ;;  %s35_s21 = int_to_ptr.vmem [resolvable:$true] %s34_s21 }
  0x15   :  { %s78_s22 = scalar_lea.vmem %s35_s21, 256  ;;  %p83_p9 = scmp.lt.s32.totalorder %s35_s21, %s35_s21 }
  0x16   :  { %27 = vst [vmem:[#allocation5] sm:$0xff] %v48_v1  ;;  %28 = vst [vmem:[#allocation5 + $0x8] sm:$0xff] %v49_v2  ;;  %p79_p8 = scmp.ne.s32.totalorder %s35_s21, %s78_s22  ;;  %p84_p10 = scmp.lt.s32.totalorder %s78_s22, %s78_s22 }
  0x18   :  { %p85_p11 = por %p84_p10, %p83_p9 }
  0x1a   :  { %p86_p12 = pnand %p85_p11, %p79_p8 }
  0x1c   :  { %89 = shalt.err (!%p86_p12)
}
  0x1d   :  { %s90_s0 = scalar_lea.hbm %s145_s1, 256 }
  0x1e   :  { %p91_p13 = scmp.ne.s32.totalorder %s145_s1, %s90_s0  ;;  %p94_p0 = scmp.lt.u32.totalorder %s90_s0, %s145_s1 }
  0x20   :  { %p96_p1 = pnand %p94_p0, %p91_p13 }
  0x22   :  { %99 = shalt.err (!%p96_p1)
}
  0x23   :  { %s108_s29 = smov 128   ;;  %s109_s30 = smov 8  }
  0x24   :  { %40 = dma.vmem_to_hbm [thread:$0]  %s35_s21, 256, %s145_s1, [#allocation4], %s108_s29, %s108_s29, %s109_s30  }
  0x25   :  { %102 = dma.done.wait [#allocation4], 256  }
  0x26   :  { %103 = vsyncadd [#allocation4], 4294967040 }
  0x27   :  { %44 = vsyncpa [#allocation3], 1 }
  0x28   :  { %45 = vsyncpa [#allocation4], 1 }

</bundles_post_ra>
